<compile_context>
chip_gen: v7x
topology: tpu7x:2x2x1
jax: 0.10.0
libtpu: 0.0.40
codegen_flags: <defaults>
</compile_context>

<pallas_src>
import jax
import jax.numpy as jnp
from jax.experimental import pallas as pl
from jax.experimental.pallas import tpu as pltpu

_TARGET_TILE_BYTES = 2 * 1024 * 1024  # ~2 MiB per x/out tile (safe on all generations)
_MAX_LANE_TILE = 1024                 # lane-dense, multiple of 128


def _pick_tiles(rows, cols, dtype):
    """Pick (TB, TN) block shape: lane-dense, sublane-aligned, ~2 MiB."""
    itemsize = jnp.dtype(dtype).itemsize
    sub_align = max(8, 32 // itemsize)  # 8 for f32, 16 for bf16, 32 for int8

    # Lane (last) dim: full extent if small, else a 128-multiple slab.
    tn = cols if cols <= _MAX_LANE_TILE else _MAX_LANE_TILE

    # Sublane dim: fill the byte budget, aligned to dtype packing.
    max_rows = max(_TARGET_TILE_BYTES // (tn * itemsize), sub_align)
    if rows <= max_rows:
        tb = rows                      # full extent — always a legal block dim
    else:
        tb = (max_rows // sub_align) * sub_align
    return tb, tn


def _add_bias_kernel(x_ref, b_ref, o_ref):
    # x_ref: (TB, TN); b_ref: (1, TN) or (TB, 1) — jnp broadcasting covers both.
    o_ref[...] = x_ref[...] + b_ref[...]


def _add_bias_row_broadcast(x2, brow):
    """out = x2 + brow, x2: (R, C), brow: (1, C) broadcast over rows."""
    R, C = x2.shape
    tb, tn = _pick_tiles(R, C, x2.dtype)
    grid = (pl.cdiv(R, tb), pl.cdiv(C, tn))
    return pl.pallas_call(
        _add_bias_kernel,
        out_shape=jax.ShapeDtypeStruct((R, C), x2.dtype),
        grid=grid,
        in_specs=[
            pl.BlockSpec((tb, tn), lambda i, j: (i, j)),
            # Bias block is independent of the row axis -> stays resident across it.
            pl.BlockSpec((1, tn), lambda i, j: (0, j)),
        ],
        out_specs=pl.BlockSpec((tb, tn), lambda i, j: (i, j)),
        compiler_params=pltpu.CompilerParams(
            dimension_semantics=("parallel", "parallel")),
    )(x2, brow)


def _add_bias_col_broadcast(x2, bcol):
    """out = x2 + bcol, x2: (R, C), bcol: (R, 1) broadcast over columns (lanes)."""
    R, C = x2.shape
    tb, tn = _pick_tiles(R, C, x2.dtype)
    grid = (pl.cdiv(R, tb), pl.cdiv(C, tn))
    return pl.pallas_call(
        _add_bias_kernel,
        out_shape=jax.ShapeDtypeStruct((R, C), x2.dtype),
        grid=grid,
        in_specs=[
            pl.BlockSpec((tb, tn), lambda i, j: (i, j)),
            # Bias block is independent of the column axis -> resident across it.
            pl.BlockSpec((tb, 1), lambda i, j: (i, 0)),
        ],
        out_specs=pl.BlockSpec((tb, tn), lambda i, j: (i, j)),
        compiler_params=pltpu.CompilerParams(
            dimension_semantics=("parallel", "parallel")),
    )(x2, bcol)


def add_bias(x, bias):
    """Pallas equivalent of AddBias.forward.

    Args:
      x:    (B, N) or (B, C, H, W) array.
      bias: (N,) / (N,1) / (C,) / (C,1) array (the PyTorch parameter is (N,1)).
    """
    bias = jnp.ravel(bias).astype(x.dtype)

    if x.ndim == 2:
        B, N = x.shape
        brow = bias.reshape(1, N)
        return _add_bias_row_broadcast(x, brow)

    elif x.ndim == 4:
        B, C, H, W = x.shape
        # Flatten to (B*C, H*W): channel bias becomes a per-row bias.
        xf = x.reshape(B * C, H * W)
        bcol = jnp.tile(bias, B).reshape(B * C, 1)  # row r -> channel r % C
        out = _add_bias_col_broadcast(xf, bcol)
        return out.reshape(B, C, H, W)

    else:
        raise ValueError(f"AddBias expects 2D or 4D input, got ndim={x.ndim}")


if __name__ == "__main__":
    key = jax.random.PRNGKey(0)
    k_x2, k_x4, k_b2, k_b4, k_xl, k_bl = jax.random.split(key, 6)

    # ---- 2D case: x (B, hidden), bias (hidden,) ----
    B, N = 2, 32
    x2 = jax.random.normal(k_x2, (B, N), dtype=jnp.float32)
    bias2 = jax.random.normal(k_b2, (N,), dtype=jnp.float32)
    out2 = jax.block_until_ready(add_bias(x2, bias2))
    ref2 = x2 + bias2.reshape(1, N)
    assert out2.shape == ref2.shape and out2.dtype == ref2.dtype
    assert jnp.allclose(out2, ref2, atol=1e-6), "2D mismatch"

    # ---- 4D case: x (B, C, H, W) NCHW, bias (C,) ----
    B, C, H, W = 2, 4, 16, 16
    x4 = jax.random.normal(k_x4, (B, C, H, W), dtype=jnp.float32)
    bias4 = jax.random.normal(k_b4, (C,), dtype=jnp.float32)
    out4 = jax.block_until_ready(add_bias(x4, bias4))
    ref4 = x4 + bias4.reshape(1, C, 1, 1)
    assert out4.shape == ref4.shape and out4.dtype == ref4.dtype
    assert jnp.allclose(out4, ref4, atol=1e-6), "4D mismatch"

    # ---- larger 2D case to exercise the multi-block tiled grid (ragged edges) ----
    Bl, Nl = 640, 2176  # rows > TB (512), cols > TN (1024), partial edge blocks
    xl = jax.random.normal(k_xl, (Bl, Nl), dtype=jnp.float32)
    biasl = jax.random.normal(k_bl, (Nl,), dtype=jnp.float32)
    outl = jax.block_until_ready(add_bias(xl, biasl))
    refl = xl + biasl.reshape(1, Nl)
    assert jnp.allclose(outl, refl, atol=1e-6), "tiled 2D mismatch"

    print("KERNEL_OK")
</pallas_src>

<mosaic_0001>
module attributes {stable_mosaic.version = 11 : i64} {
  func.func @_add_bias_kernel(%arg0: i32, %arg1: i32, %arg2: memref<2x32xf32, #tpu.memory_space<vmem>>, %arg3: memref<1x32xf32, #tpu.memory_space<vmem>>, %arg4: memref<2x32xf32, #tpu.memory_space<vmem>>) attributes {dimension_semantics = [#tpu.dimension_semantics<parallel>, #tpu.dimension_semantics<parallel>], iteration_bounds = array<i64: 1, 1>, scalar_prefetch = 0 : i64, scratch_operands = 0 : i64, tpu.core_type = #tpu.core_type<tc>, window_params = [{transform_indices = @transform_0, window_bounds = array<i64: 2, 32>}, {transform_indices = @transform_1, window_bounds = array<i64: 1, 32>}, {transform_indices = @transform_2, window_bounds = array<i64: 2, 32>}]} {
    %c0 = arith.constant 0 : index
    %c0_0 = arith.constant 0 : index
    %0 = vector.load %arg2[%c0, %c0_0] : memref<2x32xf32, #tpu.memory_space<vmem>>, vector<2x32xf32>
    %c0_1 = arith.constant 0 : index
    %c0_2 = arith.constant 0 : index
    %1 = vector.load %arg3[%c0_1, %c0_2] : memref<1x32xf32, #tpu.memory_space<vmem>>, vector<1x32xf32>
    %2 = vector.broadcast %1 : vector<1x32xf32> to vector<2x32xf32>
    %3 = arith.addf %0, %2 : vector<2x32xf32>
    %c0_3 = arith.constant 0 : index
    %c0_4 = arith.constant 0 : index
    %4 = vector.load %arg4[%c0_3, %c0_4] : memref<2x32xf32, #tpu.memory_space<vmem>>, vector<2x32xf32>
    tpu.vector_store %arg4[%c0_3, %c0_4], %3 {strides = array<i32>} : memref<2x32xf32, #tpu.memory_space<vmem>>, vector<2x32xf32>,
    return
  }
  func.func @transform_0(%arg0: i32, %arg1: i32) -> (i32, i32) {
    %c0_i32 = arith.constant 0 : i32
    return %arg0, %arg1 : i32, i32
  }
  func.func @transform_1(%arg0: i32, %arg1: i32) -> (i32, i32) {
    %c0_i32 = arith.constant 0 : i32
    %c0_i32_0 = arith.constant 0 : i32
    return %c0_i32, %arg1 : i32, i32
  }
  func.func @transform_2(%arg0: i32, %arg1: i32) -> (i32, i32) {
    %c0_i32 = arith.constant 0 : i32
    return %arg0, %arg1 : i32, i32
  }
}

</mosaic_0001>

<bundles_post_ra>
// kernel: tpu_custom_call.1
= control target key start
LH: loop header
LB: loop body
LE: loop exit
PB: predicated region body
PF: predicated region fallthrough
CT: control target
= control target key end

     0   :  { %7 = vsyncpa [#allocation3], 0  ;;  %s145_s0 = inlined_call_operand.hbm [shape: f32[2,32], index: 0, kind: input, shape index: {}]   ;;  %s146_s1 = inlined_call_operand.vmem [shape: f32[1,32], index: 1, kind: input, shape index: {}]   ;;  %s147_s2 = inlined_call_operand.hbm [shape: f32[2,32], index: 2, kind: output, shape index: {}]  }
   0x1   :  { %8 = vsyncpa [#allocation4], 0  ;;  %s101_s9 = smov [#allocation2]   ;;  %s53_s13 = scalar_lea.hbm %s145_s0, 32 }
   0x2   :  { %s15_s10 = sshll.u32 %s101_s9, 4  ;;  %p54_p0 = scmp.ne.s32.totalorder %s145_s0, %s53_s13  ;;  %s16_s10 = int_to_ptr.vmem [resolvable:$true] %s15_s10 }
   0x3   :  { %p57_p1 = scmp.lt.u32.totalorder %s53_s13, %s145_s0 }
   0x5   :  { %p59_p2 = pnand %p57_p1, %p54_p0 }
   0x7   :  { %62 = shalt.err (!%p59_p2)
}
   0x8   :  { %s63_s18 = scalar_lea.vmem %s16_s10, 32  ;;  %p68_p4 = scmp.lt.s32.totalorder %s16_s10, %s16_s10 }
   0x9   :  { %p64_p3 = scmp.ne.s32.totalorder %s16_s10, %s63_s18  ;;  %p69_p5 = scmp.lt.s32.totalorder %s63_s18, %s63_s18 }
   0xb   :  { %p70_p6 = por %p69_p5, %p68_p4 }
   0xd   :  { %p71_p7 = pnand %p70_p6, %p64_p3 }
   0xf   :  { %74 = shalt.err (!%p71_p7)
}
  0x10   :  { %18 = dma.hbm_to_vmem [thread:$0]  %s145_s0, 32, %s16_s10, [#allocation3]  }
  0x11   :  { %97 = dma.done.wait [#allocation3], 32  }
  0x12   :  { %98 = vsyncadd [#allocation3], 4294967264  ;;  %s102_s21 = smov [#allocation5]   ;;  %v24_v0 = vld [vmem:[#allocation2] sm:$0x3]  ;;  %vm33_vm0 = vcmask 254976  }
  0x13   :  { %s41_s22 = sshll.u32 %s102_s21, 4  ;;  %v50_v1 = vld [vmem:[%s146_s1] ss:$0 sm:$0xff]  ;;  %s42_s22 = int_to_ptr.vmem [resolvable:$true] %s41_s22 }
  0x14   :  { %v32_v2 = vadd.f32 %v50_v1, %v24_v0  ;;  %s75_s25 = scalar_lea.vmem %s42_s22, 32  ;;  %p80_p9 = scmp.lt.s32.totalorder %s42_s22, %s42_s22 }
  0x15   :  { %p76_p8 = scmp.ne.s32.totalorder %s42_s22, %s75_s25  ;;  %p81_p10 = scmp.lt.s32.totalorder %s75_s25, %s75_s25 }
  0x16   :  { %34 = vst.msk [vmem:[#allocation5] sm:$0x3] %vm33_vm0, %v32_v2 }
  0x17   :  { %p82_p11 = por %p81_p10, %p80_p9 }
  0x19   :  { %p83_p12 = pnand %p82_p11, %p76_p8 }
  0x1b   :  { %86 = shalt.err (!%p83_p12)
}
  0x1c   :  { %s87_s27 = scalar_lea.hbm %s147_s2, 32 }
  0x1d   :  { %p88_p13 = scmp.ne.s32.totalorder %s147_s2, %s87_s27  ;;  %p91_p0 = scmp.lt.u32.totalorder %s87_s27, %s147_s2 }
  0x1f   :  { %p93_p1 = pnand %p91_p0, %p88_p13 }
  0x21   :  { %96 = shalt.err (!%p93_p1)
}
  0x22   :  { %44 = dma.vmem_to_hbm [thread:$0]  %s42_s22, 32, %s147_s2, [#allocation4]  }
  0x23   :  { %99 = dma.done.wait [#allocation4], 32  }
  0x24   :  { %100 = vsyncadd [#allocation4], 4294967264 }
  0x25   :  { %48 = vsyncpa [#allocation3], 1 }
  0x26   :  { %49 = vsyncpa [#allocation4], 1 }

</bundles_post_ra>
